<compile_context>
chip_gen: v7x
topology: tpu7x:2x2x1
jax: 0.10.0
libtpu: 0.0.40
codegen_flags: <defaults>
</compile_context>

<pallas_src>
import jax
import jax.numpy as jnp
from jax.experimental import pallas as pl
from jax.experimental.pallas import tpu as pltpu


def _block_kernel(x_ref, w1_ref, b1_ref, w2_ref, b2_ref, o_ref):
    """Fused Block forward for NB images.

    x_ref  : (NB, H, 3*W*Cin)    conv1 input rows; the 3 kh-shifted copies are
                                 folded into the lane dim (built in wrapper)
    w1_ref : (3*W*Cin, W*Cout)   banded conv1 weights (width boundary baked in)
    b1_ref : (1, W*Cout)         conv1 bias tiled along W
    w2_ref : (3, W*Cout, W*Cout) banded conv2 weights, one slab per kernel row
    b2_ref : (1, W*Cout)         conv2 bias tiled along W
    o_ref  : (NB, H, W*Cout)     output rows (lane-dense, 128 wide)
    """
    nb, hh, no = o_ref.shape
    k1 = x_ref.shape[-1]
    rows = nb * hh

    # ---- conv1 + bias + ReLU: one lane-dense banded matmul (K = 3*W*Cin) ---
    lhs = x_ref[...].reshape(rows, k1)
    y1 = jnp.dot(lhs, w1_ref[...], preferred_element_type=jnp.float32)
    y1 = jnp.maximum(y1 + b1_ref[...], 0.0)                  # (rows, W*Cout)

    # ---- conv2 + bias + ReLU: 3 banded matmuls; height shift via XLU roll --
    rid = jax.lax.broadcasted_iota(jnp.int32, (nb, hh, 1), 1).reshape(rows, 1)
    not_top = (rid != 0).astype(jnp.float32)        # per-image row 0  -> halo
    not_bot = (rid != hh - 1).astype(jnp.float32)   # per-image row H-1 -> halo

    acc = jnp.dot(y1, w2_ref[1], preferred_element_type=jnp.float32)

    up = pltpu.roll(y1, 1, 0) * not_top             # row r <- y1[r-1], halo=0
    acc = acc + jnp.dot(up, w2_ref[0], preferred_element_type=jnp.float32)

    dn = pltpu.roll(y1, rows - 1, 0) * not_bot      # row r <- y1[r+1], halo=0
    acc = acc + jnp.dot(dn, w2_ref[2], preferred_element_type=jnp.float32)

    y2 = jnp.maximum(acc + b2_ref[...], 0.0)
    o_ref[...] = y2.reshape(nb, hh, no).astype(o_ref.dtype)


def _banded_weights(w_hwio, out_w):
    """(3,3,Ci,Co) HWIO -> (3, W*Ci, W*Co) banded per-kernel-row matrices with
    the width 'same' boundary baked in as zero columns at the band edges:

      big[kh, j*Ci + c, w*Co + o] = w[kh, j-w+1, c, o]  if 0 <= j-w+1 < 3 else 0

    so  out_row[w*Co+o] = sum_kh  x_row[h+kh-1] @ big[kh]   (height halo rows
    are handled separately)."""
    _, _, ci, co = w_hwio.shape
    j = jnp.arange(out_w)
    wpos = jnp.arange(out_w)
    kw = jnp.arange(3)
    ind = (j[None, :, None] == wpos[None, None, :] + kw[:, None, None] - 1)
    ind = ind.astype(w_hwio.dtype)                        # (3, W, W)
    big = jnp.einsum('kjw,hkco->hjcwo', ind, w_hwio)      # (3, W, Ci, W, Co)
    return big.reshape(3, out_w * ci, out_w * co)


def _tensorcores_per_chip():
    """Best-effort detection of multi-TensorCore chips (v4/v5p megacore, v7x)."""
    try:
        kind = jax.devices()[0].device_kind.lower()
    except Exception:
        return 1
    if any(tag in kind for tag in ("v7", "v4", "v5p")):
        return 2
    return 1


def _pick_batch_block(n, h, w, cin, cout):
    """Images per grid step: fill a generation-aware VMEM budget; keep >=2 grid
    steps only on multi-TensorCore chips (single-TC chips prefer 1 big step)."""
    bytes_per_img = 4 * (h * 3 * w * cin * 2      # double-buffered input rows
                         + h * w * cout * 2       # double-buffered output rows
                         + 4 * h * w * cout)      # conv1 activation + shifted copies
    weight_bytes = 4 * 2 * (3 * w * cin * w * cout     # w1b (double-buffered)
                            + 3 * w * cout * w * cout  # w2b
                            + 2 * w * cout)            # biases
    try:
        vmem_cap = int(pltpu.get_tpu_info().vmem_capacity_bytes)
    except Exception:
        vmem_cap = 64 * 1024 * 1024
    budget = min(vmem_cap // 4, 12 * 1024 * 1024)       # leave scoped-VMEM headroom
    nb = max(1, (budget - weight_bytes) // max(bytes_per_img, 1))
    nb = min(int(nb), n)
    if _tensorcores_per_chip() > 1 and n >= 2:
        nb = min(nb, max(1, -(-n // 2)))                 # >=2 steps for 2 TCs
    return max(nb, 1)


def block_forward(x_nchw, params):
    """Forward pass of `Block`. x_nchw: (N, Cin, H, W), like PyTorch."""
    w1, b1, w2, b2 = params                  # HWIO weights, (Cout,) biases
    n, cin, h, w = x_nchw.shape
    cout = w1.shape[-1]

    # One-time glue in XLA (tiny): NCHW -> lane-dense NHWC rows, height halo
    # for conv1, and fold the 3 kh-shifted copies into the lane dim so every
    # in-kernel access is lane/sublane aligned.
    x = jnp.transpose(x_nchw, (0, 2, 3, 1)).reshape(n, h, w * cin)
    xp = jnp.pad(x, ((0, 0), (1, 1), (0, 0)))
    x3 = jnp.concatenate([xp[:, kh:kh + h, :] for kh in range(3)], axis=-1)

    w1b = _banded_weights(w1, w).reshape(3 * w * cin, w * cout)  # (192, 128)
    w2b = _banded_weights(w2, w)                                 # (3, 128, 128)
    b1t = jnp.tile(b1, w).reshape(1, w * cout)
    b2t = jnp.tile(b2, w).reshape(1, w * cout)

    nb = _pick_batch_block(n, h, w, cin, cout)
    steps = pl.cdiv(n, nb)
    n_pad = steps * nb
    if n_pad != n:                           # ragged batch: pad, slice at the end
        x3 = jnp.pad(x3, ((0, n_pad - n), (0, 0), (0, 0)))

    out = pl.pallas_call(
        _block_kernel,
        out_shape=jax.ShapeDtypeStruct((n_pad, h, w * cout), x_nchw.dtype),
        grid_spec=pltpu.PrefetchScalarGridSpec(
            num_scalar_prefetch=0,
            grid=(steps,),
            in_specs=[
                pl.BlockSpec((nb, h, 3 * w * cin), lambda i: (i, 0, 0)),
                pl.BlockSpec(w1b.shape, lambda i: (0, 0)),
                pl.BlockSpec(b1t.shape, lambda i: (0, 0)),
                pl.BlockSpec(w2b.shape, lambda i: (0, 0, 0)),
                pl.BlockSpec(b2t.shape, lambda i: (0, 0)),
            ],
            out_specs=pl.BlockSpec((nb, h, w * cout), lambda i: (i, 0, 0)),
        ),
        compiler_params=pltpu.CompilerParams(
            dimension_semantics=("parallel",),
            vmem_limit_bytes=32 * 1024 * 1024),
    )(x3, w1b, b1t, w2b, b2t)

    out = out[:n].reshape(n, h, w, cout)
    return jnp.transpose(out, (0, 3, 1, 2))              # NHWC -> NCHW


def init_params(key, in_channels, out_channels):
    """Deterministic synthetic parameters (PyTorch shapes: OIHW weights)."""
    k1, k2, k3, k4 = jax.random.split(key, 4)
    bound1 = 1.0 / (in_channels * 9) ** 0.5
    bound2 = 1.0 / (out_channels * 9) ** 0.5
    w1_oihw = jax.random.uniform(k1, (out_channels, in_channels, 3, 3),
                                 jnp.float32, -bound1, bound1)
    b1 = jax.random.uniform(k2, (out_channels,), jnp.float32, -bound1, bound1)
    w2_oihw = jax.random.uniform(k3, (out_channels, out_channels, 3, 3),
                                 jnp.float32, -bound2, bound2)
    b2 = jax.random.uniform(k4, (out_channels,), jnp.float32, -bound2, bound2)
    # OIHW -> HWIO for the NHWC formulation.
    w1 = jnp.transpose(w1_oihw, (2, 3, 1, 0))
    w2 = jnp.transpose(w2_oihw, (2, 3, 1, 0))
    return w1, b1, w2, b2


def _reference_forward(x_nchw, params):
    """Pure-JAX reference (matches PyTorch Conv2d semantics)."""
    w1, b1, w2, b2 = params
    dn = ("NCHW", "HWIO", "NCHW")
    y = jax.lax.conv_general_dilated(x_nchw, w1, (1, 1), "SAME",
                                     dimension_numbers=dn)
    y = jax.nn.relu(y + b1[None, :, None, None])
    y = jax.lax.conv_general_dilated(y, w2, (1, 1), "SAME",
                                     dimension_numbers=dn)
    y = jax.nn.relu(y + b2[None, :, None, None])
    return y


if __name__ == "__main__":
    key = jax.random.PRNGKey(0)
    kx, kp = jax.random.split(key)

    N, Cin, Cout, H, W = 2, 4, 8, 16, 16
    x = jax.random.normal(kx, (N, Cin, H, W), jnp.float32)
    params = init_params(kp, Cin, Cout)

    fwd = jax.jit(block_forward)
    out = jax.block_until_ready(fwd(x, params))

    ref = jax.block_until_ready(_reference_forward(x, params))
    assert out.shape == (N, Cout, H, W), out.shape
    assert jnp.allclose(out, ref, rtol=1e-2, atol=1e-2), (
        float(jnp.max(jnp.abs(out - ref))))

    print("KERNEL_OK")
</pallas_src>

<mosaic_0001>
module attributes {stable_mosaic.version = 11 : i64} {
  func.func @_block_kernel(%arg0: i32, %arg1: memref<2x16x192xf32, #tpu.memory_space<vmem>>, %arg2: memref<192x128xf32, #tpu.memory_space<vmem>>, %arg3: memref<1x128xf32, #tpu.memory_space<vmem>>, %arg4: memref<3x128x128xf32, #tpu.memory_space<vmem>>, %arg5: memref<1x128xf32, #tpu.memory_space<vmem>>, %arg6: memref<2x16x128xf32, #tpu.memory_space<vmem>>) attributes {dimension_semantics = [#tpu.dimension_semantics<parallel>], iteration_bounds = array<i64: 1>, scalar_prefetch = 0 : i64, scratch_operands = 0 : i64, tpu.core_type = #tpu.core_type<tc>, window_params = [{transform_indices = @transform_0, window_bounds = array<i64: 2, 16, 192>}, {pipeline_mode = #tpu.pipeline_mode<synchronous>, transform_indices = @transform_1, window_bounds = array<i64: 192, 128>}, {pipeline_mode = #tpu.pipeline_mode<synchronous>, transform_indices = @transform_2, window_bounds = array<i64: 1, 128>}, {pipeline_mode = #tpu.pipeline_mode<synchronous>, transform_indices = @transform_3, window_bounds = array<i64: 3, 128, 128>}, {pipeline_mode = #tpu.pipeline_mode<synchronous>, transform_indices = @transform_4, window_bounds = array<i64: 1, 128>}, {transform_indices = @transform_5, window_bounds = array<i64: 2, 16, 128>}]} {
    %c0 = arith.constant 0 : index
    %c0_0 = arith.constant 0 : index
    %c0_1 = arith.constant 0 : index
    %0 = vector.load %arg1[%c0, %c0_0, %c0_1] : memref<2x16x192xf32, #tpu.memory_space<vmem>>, vector<2x16x192xf32>
    %1 = vector.shape_cast %0 : vector<2x16x192xf32> to vector<32x192xf32>
    %c0_2 = arith.constant 0 : index
    %c0_3 = arith.constant 0 : index
    %2 = vector.load %arg2[%c0_2, %c0_3] : memref<192x128xf32, #tpu.memory_space<vmem>>, vector<192x128xf32>
    %cst = arith.constant dense<0.000000e+00> : vector<32x128xf32>
    %3 = tpu.matmul %1, %2, %cst {dimension_numbers = #tpu.dot_dimension_numbers<[1], [0], [0], [1], [0, 0, 1, 1], [], []>} : vector<32x192xf32>, vector<192x128xf32>, vector<32x128xf32> -> vector<32x128xf32>
    %c0_4 = arith.constant 0 : index
    %c0_5 = arith.constant 0 : index
    %4 = vector.load %arg3[%c0_4, %c0_5] : memref<1x128xf32, #tpu.memory_space<vmem>>, vector<1x128xf32>
    %5 = vector.broadcast %4 : vector<1x128xf32> to vector<32x128xf32>
    %6 = arith.addf %3, %5 : vector<32x128xf32>
    %cst_6 = arith.constant 0.000000e+00 : f32
    %7 = vector.broadcast %cst_6 : f32 to vector<32x128xf32>
    %8 = arith.maximumf %6, %7 : vector<32x128xf32>
    %9 = tpu.iota {dimensions = array<i32: 1>} : vector<2x16x1xi32>
    %10 = vector.shape_cast %9 : vector<2x16x1xi32> to vector<32x1xi32>
    %c0_i32 = arith.constant 0 : i32
    %11 = vector.broadcast %c0_i32 : i32 to vector<32x1xi32>
    %12 = arith.cmpi ne, %10, %11 : vector<32x1xi32>
    %13 = arith.extui %12 : vector<32x1xi1> to vector<32x1xi32>
    %14 = arith.sitofp %13 : vector<32x1xi32> to vector<32x1xf32>
    %c15_i32 = arith.constant 15 : i32
    %15 = vector.broadcast %c15_i32 : i32 to vector<32x1xi32>
    %16 = arith.cmpi ne, %10, %15 : vector<32x1xi32>
    %17 = arith.extui %16 : vector<32x1xi1> to vector<32x1xi32>
    %18 = arith.sitofp %17 : vector<32x1xi32> to vector<32x1xf32>
    %c1 = arith.constant 1 : index
    %c0_7 = arith.constant 0 : index
    %c0_8 = arith.constant 0 : index
    %19 = vector.load %arg4[%c1, %c0_7, %c0_8] : memref<3x128x128xf32, #tpu.memory_space<vmem>>, vector<1x128x128xf32>
    %20 = vector.shape_cast %19 : vector<1x128x128xf32> to vector<128x128xf32>
    %cst_9 = arith.constant dense<0.000000e+00> : vector<32x128xf32>
    %21 = tpu.matmul %8, %20, %cst_9 {dimension_numbers = #tpu.dot_dimension_numbers<[1], [0], [0], [1], [0, 0, 1, 1], [], []>} : vector<32x128xf32>, vector<128x128xf32>, vector<32x128xf32> -> vector<32x128xf32>
    %c1_i32 = arith.constant 1 : i32
    %22 = tpu.dynamic_rotate %8 by %c1_i32 dim 0 : vector<32x128xf32>, i32 -> vector<32x128xf32>
    %23 = vector.broadcast %14 : vector<32x1xf32> to vector<32x128xf32>
    %24 = arith.mulf %22, %23 : vector<32x128xf32>
    %c0_10 = arith.constant 0 : index
    %c0_11 = arith.constant 0 : index
    %c0_12 = arith.constant 0 : index
    %25 = vector.load %arg4[%c0_10, %c0_11, %c0_12] : memref<3x128x128xf32, #tpu.memory_space<vmem>>, vector<1x128x128xf32>
    %26 = vector.shape_cast %25 : vector<1x128x128xf32> to vector<128x128xf32>
    %cst_13 = arith.constant dense<0.000000e+00> : vector<32x128xf32>
    %27 = tpu.matmul %24, %26, %cst_13 {dimension_numbers = #tpu.dot_dimension_numbers<[1], [0], [0], [1], [0, 0, 1, 1], [], []>} : vector<32x128xf32>, vector<128x128xf32>, vector<32x128xf32> -> vector<32x128xf32>
    %28 = arith.addf %21, %27 : vector<32x128xf32>
    %c31_i32 = arith.constant 31 : i32
    %29 = tpu.dynamic_rotate %8 by %c31_i32 dim 0 : vector<32x128xf32>, i32 -> vector<32x128xf32>
    %30 = vector.broadcast %18 : vector<32x1xf32> to vector<32x128xf32>
    %31 = arith.mulf %29, %30 : vector<32x128xf32>
    %c2 = arith.constant 2 : index
    %c0_14 = arith.constant 0 : index
    %c0_15 = arith.constant 0 : index
    %32 = vector.load %arg4[%c2, %c0_14, %c0_15] : memref<3x128x128xf32, #tpu.memory_space<vmem>>, vector<1x128x128xf32>
    %33 = vector.shape_cast %32 : vector<1x128x128xf32> to vector<128x128xf32>
    %cst_16 = arith.constant dense<0.000000e+00> : vector<32x128xf32>
    %34 = tpu.matmul %31, %33, %cst_16 {dimension_numbers = #tpu.dot_dimension_numbers<[1], [0], [0], [1], [0, 0, 1, 1], [], []>} : vector<32x128xf32>, vector<128x128xf32>, vector<32x128xf32> -> vector<32x128xf32>
    %35 = arith.addf %28, %34 : vector<32x128xf32>
    %c0_17 = arith.constant 0 : index
    %c0_18 = arith.constant 0 : index
    %36 = vector.load %arg5[%c0_17, %c0_18] : memref<1x128xf32, #tpu.memory_space<vmem>>, vector<1x128xf32>
    %37 = vector.broadcast %36 : vector<1x128xf32> to vector<32x128xf32>
    %38 = arith.addf %35, %37 : vector<32x128xf32>
    %cst_19 = arith.constant 0.000000e+00 : f32
    %39 = vector.broadcast %cst_19 : f32 to vector<32x128xf32>
    %40 = arith.maximumf %38, %39 : vector<32x128xf32>
    %41 = vector.shape_cast %40 : vector<32x128xf32> to vector<2x16x128xf32>
    %c0_20 = arith.constant 0 : index
    %c0_21 = arith.constant 0 : index
    %c0_22 = arith.constant 0 : index
    %42 = vector.load %arg6[%c0_20, %c0_21, %c0_22] : memref<2x16x128xf32, #tpu.memory_space<vmem>>, vector<2x16x128xf32>
    tpu.vector_store %arg6[%c0_20, %c0_21, %c0_22], %41 {strides = array<i32>} : memref<2x16x128xf32, #tpu.memory_space<vmem>>, vector<2x16x128xf32>,
    return
  }
  func.func @transform_0(%arg0: i32) -> (i32, i32, i32) {
    %c0_i32 = arith.constant 0 : i32
    %c0_i32_0 = arith.constant 0 : i32
    %c0_i32_1 = arith.constant 0 : i32
    return %arg0, %c0_i32, %c0_i32_0 : i32, i32, i32
  }
  func.func @transform_1(%arg0: i32) -> (i32, i32) {
    %c0_i32 = arith.constant 0 : i32
    %c0_i32_0 = arith.constant 0 : i32
    %c0_i32_1 = arith.constant 0 : i32
    return %c0_i32, %c0_i32_0 : i32, i32
  }
  func.func @transform_2(%arg0: i32) -> (i32, i32) {
    %c0_i32 = arith.constant 0 : i32
    %c0_i32_0 = arith.constant 0 : i32
    %c0_i32_1 = arith.constant 0 : i32
    return %c0_i32, %c0_i32_0 : i32, i32
  }
  func.func @transform_3(%arg0: i32) -> (i32, i32, i32) {
    %c0_i32 = arith.constant 0 : i32
    %c0_i32_0 = arith.constant 0 : i32
    %c0_i32_1 = arith.constant 0 : i32
    %c0_i32_2 = arith.constant 0 : i32
    return %c0_i32, %c0_i32_0, %c0_i32_1 : i32, i32, i32
  }
  func.func @transform_4(%arg0: i32) -> (i32, i32) {
    %c0_i32 = arith.constant 0 : i32
    %c0_i32_0 = arith.constant 0 : i32
    %c0_i32_1 = arith.constant 0 : i32
    return %c0_i32, %c0_i32_0 : i32, i32
  }
  func.func @transform_5(%arg0: i32) -> (i32, i32, i32) {
    %c0_i32 = arith.constant 0 : i32
    %c0_i32_0 = arith.constant 0 : i32
    %c0_i32_1 = arith.constant 0 : i32
    return %arg0, %c0_i32, %c0_i32_0 : i32, i32, i32
  }
}

</mosaic_0001>

<bundles_post_ra>
// kernel: tile.13
= control target key start
LH: loop header
LB: loop body
LE: loop exit
PB: predicated region body
PF: predicated region fallthrough
CT: control target
= control target key end

     0   :  { %s28_s0 = inlined_call_operand.vmem [shape: f32[8], index: 0, kind: input, shape index: {}]   ;;  %s29_s1 = inlined_call_operand.vmem [shape: f32[16,8], index: 1, kind: output, shape index: {}]  }
   0x1   :  { %v4_v0 = vld [vmem:[%s28_s0] ss:$0 sm:$0xff] }
   0x2   :  { %5 = vst [vmem:[%s29_s1] sm:$0xff] %v4_v0  ;;  %8 = vst [vmem:[%s29_s1 + $0x8] sm:$0xff] %v4_v0 }

// kernel: tile.14
= control target key start
LH: loop header
LB: loop body
LE: loop exit
PB: predicated region body
PF: predicated region fallthrough
CT: control target
= control target key end

     0   :  { %s131_s10 = smov 120   ;;  %s132_s11 = smov 104   ;;  %vm3_vm0 = vcmask 64512   ;;  %vm9_vm1 = vcmask 1048512   ;;  %vm15_vm2 = vcmask 982912   ;;  %vm21_vm3 = vcmask 917312   ;;  %s207_s0 = inlined_call_operand.vmem [shape: f32[16,8], index: 0, kind: input, shape index: {}]   ;;  %s208_s1 = inlined_call_operand.vmem [shape: f32[1,128], index: 1, kind: output, shape index: {}]  }
   0x1   :  { %v101_v0 = vld [vmem:[%s207_s0 + $0xf] sm:$0x1]   ;;  %v103_v1 = vld [vmem:[%s207_s0 + $0xd] sm:$0x1]   ;;  %v102_v2 = vld [vmem:[%s207_s0 + $0xe] sm:$0x1]  }
   0x2   :  { %7 = vrot.lane.b32.xlu0 %v101_v0, %s131_s10  ;;  %19 = vrot.lane.b32.xlu1 %v103_v1, %s132_s11  ;;  %v104_v3 = vld [vmem:[%s207_s0 + $0xc] sm:$0x1]   ;;  %s133_s16 = smov 112   ;;  %s134_s17 = smov 96   ;;  %v105_v4 = vld [vmem:[%s207_s0 + $0xb] sm:$0x1]  }
   0x3   :  { %v106_v5 = vld [vmem:[%s207_s0 + $0xa] sm:$0x1]   ;;  %v2_v6 = vld [vmem:[%s207_s0] sm:$0x1]   ;;  %s135_s24 = smov 88   ;;  %s136_s25 = smov 80  }
   0x4   :  { %4 = vst.msk [vmem:[#allocation0] sm:$0x1] %vm3_vm0, %v2_v6   ;;  %v107_v7 = vld [vmem:[%s207_s0 + $0x9] sm:$0x1]   ;;  %v108_v8 = vld [vmem:[%s207_s0 + $0x8] sm:$0x1]  }
   0x5   :  { %s137_s30 = smov 72   ;;  %s138_s2 = smov 64   ;;  %v109_v9 = vld [vmem:[%s207_s0 + $0x7] sm:$0x1]   ;;  %v110_v10 = vld [vmem:[%s207_s0 + $0x6] sm:$0x1]  }
   0x6   :  { %13 = vrot.lane.b32.xlu0 %v102_v2, %s133_s16  ;;  %25 = vrot.lane.b32.xlu1 %v104_v3, %s134_s17  ;;  %s139_s7 = smov 56   ;;  %s140_s8 = smov 48   ;;  %v111_v11 = vld [vmem:[%s207_s0 + $0x5] sm:$0x1]   ;;  %v112_v12 = vld [vmem:[%s207_s0 + $0x4] sm:$0x1]  }
   0x7   :  { %s141_s13 = smov 40   ;;  %s142_s14 = smov 32   ;;  %v113_v13 = vld [vmem:[%s207_s0 + $0x3] sm:$0x1]   ;;  %v114_v14 = vld [vmem:[%s207_s0 + $0x2] sm:$0x1]  }
   0x8   :  { %s143_s19 = smov 24   ;;  %s144_s20 = smov 16   ;;  %v115_v15 = vld [vmem:[%s207_s0 + $0x1] sm:$0x1]   ;;  %vm27_vm4 = vcmask 851712   ;;  %vm33_vm5 = vcmask 786112  }
   0x9   :  { %s145_s0 = smov 8   ;;  %vm39_vm6 = vcmask 720512   ;;  %vm45_vm7 = vcmask 654912   ;;  %vm51_vm8 = vcmask 589312   ;;  %vm57_vm9 = vcmask 523712  }
   0xa   :  { %31 = vrot.lane.b32.xlu0 %v105_v4, %s135_s24  ;;  %37 = vrot.lane.b32.xlu1 %v106_v5, %s136_s25  ;;  %vm63_vm10 = vcmask 458112   ;;  %vm69_vm11 = vcmask 392512   ;;  %vm75_vm12 = vcmask 326912   ;;  %vm81_vm13 = vcmask 261312  }
   0xb   :  { %vm87_vm14 = vcmask 195712   ;;  %vm93_vm15 = vcmask 130112  }
   0xe   :  { %43 = vrot.lane.b32.xlu0 %v107_v7, %s137_s30  ;;  %49 = vrot.lane.b32.xlu1 %v108_v8, %s138_s2 }
  0x12   :  { %55 = vrot.lane.b32.xlu0 %v109_v9, %s139_s7  ;;  %61 = vrot.lane.b32.xlu1 %v110_v10, %s140_s8 }
  0x16   :  { %67 = vrot.lane.b32.xlu0 %v111_v11, %s141_s13  ;;  %73 = vrot.lane.b32.xlu1 %v112_v12, %s142_s14 }
  0x1a   :  { %79 = vrot.lane.b32.xlu0 %v113_v13, %s143_s19  ;;  %85 = vrot.lane.b32.xlu1 %v114_v14, %s144_s20 }
  0x1e   :  { %91 = vrot.lane.b32.xlu0 %v115_v15, %s145_s0 }
  0x74   :  { %v8_v16 = vpop.permute.xlu0 %7   ;;  %v20_v17 = vpop.permute.xlu1 %19  }
  0x75   :  { %10 = vst.msk [vmem:[#allocation0] sm:$0x1] %vm9_vm1, %v8_v16  }
  0x78   :  { %v14_v18 = vpop.permute.xlu0 %13   ;;  %v26_v19 = vpop.permute.xlu1 %25  }
  0x79   :  { %16 = vst.msk [vmem:[#allocation0] sm:$0x1] %vm15_vm2, %v14_v18  }
  0x7a   :  { %22 = vst.msk [vmem:[#allocation0] sm:$0x1] %vm21_vm3, %v20_v17  }
  0x7b   :  { %28 = vst.msk [vmem:[#allocation0] sm:$0x1] %vm27_vm4, %v26_v19  }
  0x7c   :  { %v32_v20 = vpop.permute.xlu0 %31   ;;  %v38_v21 = vpop.permute.xlu1 %37  }
  0x7d   :  { %34 = vst.msk [vmem:[#allocation0] sm:$0x1] %vm33_vm5, %v32_v20  }
  0x7e   :  { %40 = vst.msk [vmem:[#allocation0] sm:$0x1] %vm39_vm6, %v38_v21  }
  0x80   :  { %v44_v22 = vpop.permute.xlu0 %43   ;;  %v50_v23 = vpop.permute.xlu1 %49  }
  0x81   :  { %46 = vst.msk [vmem:[#allocation0] sm:$0x1] %vm45_vm7, %v44_v22  }
  0x82   :  { %52 = vst.msk [vmem:[#allocation0] sm:$0x1] %vm51_vm8, %v50_v23  }
  0x84   :  { %v56_v24 = vpop.permute.xlu0 %55   ;;  %v62_v25 = vpop.permute.xlu1 %61  }
  0x85   :  { %58 = vst.msk [vmem:[#allocation0] sm:$0x1] %vm57_vm9, %v56_v24  }
  0x86   :  { %64 = vst.msk [vmem:[#allocation0] sm:$0x1] %vm63_vm10, %v62_v25  }
  0x88   :  { %v68_v26 = vpop.permute.xlu0 %67   ;;  %v74_v27 = vpop.permute.xlu1 %73  }
  0x89   :  { %70 = vst.msk [vmem:[#allocation0] sm:$0x1] %vm69_vm11, %v68_v26  }
  0x8a   :  { %76 = vst.msk [vmem:[#allocation0] sm:$0x1] %vm75_vm12, %v74_v27  }
  0x8c   :  { %v80_v28 = vpop.permute.xlu0 %79   ;;  %v86_v29 = vpop.permute.xlu1 %85  }
  0x8d   :  { %82 = vst.msk [vmem:[#allocation0] sm:$0x1] %vm81_vm13, %v80_v28  }
  0x8e   :  { %88 = vst.msk [vmem:[#allocation0] sm:$0x1] %vm87_vm14, %v86_v29  }
  0x90   :  { %v92_v30 = vpop.permute.xlu0 %91  }
  0x91   :  { %94 = vst.msk [vmem:[#allocation0] sm:$0x1] %vm93_vm15, %v92_v30  }
  0x98   :  { %v98_v31 = vld [vmem:[#allocation0] sm:$0x1] }
  0x99   :  { %100 = vst [vmem:[%s208_s1] sm:$0x1] %v98_v31 }

// kernel: block_forward.1
= control target key start
LH: loop header
LB: loop body
LE: loop exit
PB: predicated region body
PF: predicated region fallthrough
CT: control target
= control target key end

     0   :  { %v890_v0 = vmov 0.0|0.0   ;;  %vm59_vm0 = vcmask 523264   ;;  %s1218_s1 = inlined_call_operand.vmem [shape: f32[192,128], index: 1, kind: input, shape index: {}]   ;;  %s1219_s0 = inlined_call_operand.vmem [shape: f32[2,16,192], index: 0, kind: input, shape index: {}]   ;;  %s1220_s3 = inlined_call_operand.vmem [shape: f32[3,128,128], index: 3, kind: input, shape index: {}]   ;;  %s1221_s2 = inlined_call_operand.vmem [shape: f32[1,128], index: 2, kind: input, shape index: {}]   ;;  %s1222_s4 = inlined_call_operand.vmem [shape: f32[1,128], index: 4, kind: input, shape index: {}]   ;;  %s1223_s5 = inlined_call_operand.vmem [shape: f32[2,16,128], index: 5, kind: output, shape index: {}]  }
   0x1   :  { %748 = vmatprep.subr.bf16.mxu0 %v890_v0  ;;  %v28_v1 = vld [vmem:[%s1218_s1] sm:$0xff]  ;;  %v29_v2 = vld [vmem:[%s1218_s1 + $0x8] sm:$0xff]  ;;  %v30_v3 = vld [vmem:[%s1218_s1 + $0x10] sm:$0xff] }
   0x2   :  { %v749_v4 = vpack.c.bf16 %v29_v2, %v28_v1  ;;  %v31_v5 = vld [vmem:[%s1218_s1 + $0x18] sm:$0xff]  ;;  %v32_v7 = vld [vmem:[%s1218_s1 + $0x20] sm:$0xff]  ;;  %v33_v8 = vld [vmem:[%s1218_s1 + $0x28] sm:$0xff] }
   0x3   :  { %v752_v6 = vpack.c.bf16 %v31_v5, %v30_v3  ;;  %v755_v9 = vpack.c.bf16 %v33_v8, %v32_v7  ;;  %v34_v10 = vld [vmem:[%s1218_s1 + $0x30] sm:$0xff]  ;;  %v35_v11 = vld [vmem:[%s1218_s1 + $0x38] sm:$0xff]  ;;  %v21_v12 = vld [vmem:[%s1219_s0 + $0x8] sm:$0xff] }
   0x4   :  { %750 = vmatpush1.bf16.msra.mxu0 %v749_v4  ;;  %535 = vmatprep.mubr.msk.f32.mxu0 %vm59_vm0, %v21_v12  ;;  %v541_v13 = vld [vmem:[%s1220_s3 + $0x80] sm:$0xff]  ;;  %v758_v14 = vpack.c.bf16 %v35_v11, %v34_v10  ;;  %v542_v15 = vld [vmem:[%s1220_s3 + $0x88] sm:$0xff]  ;;  %v543_v16 = vld [vmem:[%s1220_s3 + $0x90] sm:$0xff] }
   0x5   :  { %751 = vmatprep.subr.bf16.mxu0 %v890_v0  ;;  %v544_v17 = vld [vmem:[%s1220_s3 + $0x98] sm:$0xff]  ;;  %v36_v18 = vld [vmem:[%s1218_s1 + $0x40] sm:$0xff]  ;;  %v37_v19 = vld [vmem:[%s1218_s1 + $0x48] sm:$0xff]  ;;  %v816_v20 = vpack.c.bf16 %v542_v15, %v541_v13 }
   0x6   :  { %v820_v21 = vpack.c.bf16 %v544_v17, %v543_v16  ;;  %v545_v22 = vld [vmem:[%s1220_s3 + $0xa0] sm:$0xff]  ;;  %v546_v23 = vld [vmem:[%s1220_s3 + $0xa8] sm:$0xff]  ;;  %v761_v24 = vpack.c.bf16 %v37_v19, %v36_v18  ;;  %v38_v25 = vld [vmem:[%s1218_s1 + $0x50] sm:$0xff] }
   0x7   :  { %817 = vmatprep.subr.bf16.mxu1 %v816_v20  ;;  %v39_v26 = vld [vmem:[%s1218_s1 + $0x58] sm:$0xff]  ;;  %v824_v27 = vpack.c.bf16 %v546_v23, %v545_v22  ;;  %v547_v28 = vld [vmem:[%s1220_s3 + $0xb0] sm:$0xff]  ;;  %v40_v31 = vld [vmem:[%s1218_s1 + $0x60] sm:$0xff] }
   0x8   :  { %753 = vmatpush1.bf16.msra.mxu0 %v752_v6  ;;  %819 = vmatpush3.bf16.msra.mxu1 %v816_v20  ;;  %v548_v29 = vld [vmem:[%s1220_s3 + $0xb8] sm:$0xff]  ;;  %v764_v30 = vpack.c.bf16 %v39_v26, %v38_v25  ;;  %v41_v32 = vld [vmem:[%s1218_s1 + $0x68] sm:$0xff]  ;;  %v549_v34 = vld [vmem:[%s1220_s3 + $0xc0] sm:$0xff] }
   0x9   :  { %754 = vmatprep.subr.bf16.mxu0 %v890_v0  ;;  %821 = vmatprep.subr.bf16.mxu1 %v820_v21  ;;  %v828_v33 = vpack.c.bf16 %v548_v29, %v547_v28  ;;  %v550_v35 = vld [vmem:[%s1220_s3 + $0xc8] sm:$0xff]  ;;  %v767_v36 = vpack.c.bf16 %v41_v32, %v40_v31  ;;  %v42_v37 = vld [vmem:[%s1218_s1 + $0x70] sm:$0xff]  ;;  %v43_v38 = vld [vmem:[%s1218_s1 + $0x78] sm:$0xff] }
   0xa   :  { %v832_v39 = vpack.c.bf16 %v550_v35, %v549_v34  ;;  %v551_v40 = vld [vmem:[%s1220_s3 + $0xd0] sm:$0xff]  ;;  %v552_v41 = vld [vmem:[%s1220_s3 + $0xd8] sm:$0xff]  ;;  %v770_v42 = vpack.c.bf16 %v43_v38, %v42_v37  ;;  %v44_v43 = vld [vmem:[%s1218_s1 + $0x80] sm:$0xff]  ;;  %v161_v34 = vlaneseq }
   0xb   :  { %v45_v44 = vld [vmem:[%s1218_s1 + $0x88] sm:$0xff]  ;;  %v836_v45 = vpack.c.bf16 %v552_v41, %v551_v40  ;;  %v46_v47 = vld [vmem:[%s1218_s1 + $0x90] sm:$0xff]  ;;  %v47_v48 = vld [vmem:[%s1218_s1 + $0x98] sm:$0xff] }
   0xc   :  { %756 = vmatpush1.bf16.msra.mxu0 %v755_v9  ;;  %823 = vmatpush3.bf16.msra.mxu1 %v820_v21  ;;  %v773_v46 = vpack.c.bf16 %v45_v44, %v44_v43  ;;  %v776_v49 = vpack.c.bf16 %v47_v48, %v46_v47  ;;  %v48_v50 = vld [vmem:[%s1218_s1 + $0xa0] sm:$0xff]  ;;  %v49_v51 = vld [vmem:[%s1218_s1 + $0xa8] sm:$0xff]  ;;  %v50_v53 = vld [vmem:[%s1218_s1 + $0xb0] sm:$0xff]  ;;  %v1145_v41 = vshrl.u32 %v161_v34, 7 }
   0xd   :  { %757 = vmatprep.subr.bf16.mxu0 %v890_v0  ;;  %825 = vmatprep.subr.bf16.mxu1 %v824_v27  ;;  %v779_v52 = vpack.c.bf16 %v49_v51, %v48_v50  ;;  %v51_v54 = vld [vmem:[%s1218_s1 + $0xb8] sm:$0xff]  ;;  %v206_v55 = vld [vmem:[%s1220_s3] sm:$0xff]  ;;  %v207_v56 = vld [vmem:[%s1220_s3 + $0x8] sm:$0xff] }
   0xe   :  { %v782_v57 = vpack.c.bf16 %v51_v54, %v50_v53  ;;  %v784_v58 = vpack.c.bf16 %v207_v56, %v206_v55  ;;  %v208_v59 = vld [vmem:[%s1220_s3 + $0x10] sm:$0xff]  ;;  %v209_v60 = vld [vmem:[%s1220_s3 + $0x18] sm:$0xff]  ;;  %v20_v61 = vld [vmem:[%s1219_s0] sm:$0xff]  ;;  %vm396_vm1 = vcmp.lt.s32.totalorder %v1145_v41, 7  ;;  %vm197_vm2 = vcmp.lt.s32.totalorder %v1145_v41, 1 }
   0xf   :  { %v23_v62 = vld [vmem:[%s1219_s0 + $0x18] sm:$0xff]  ;;  %v788_v63 = vpack.c.bf16 %v209_v60, %v208_v59  ;;  %v211_v1 = vld [vmem:[%s1220_s3 + $0x28] sm:$0xff]  ;;  %v22_v2 = vld [vmem:[%s1219_s0 + $0x10] sm:$0xff]  ;;  %vm164_vm3 = vcmp.ne.s32.totalorder %v1145_v41, 0 }
  0x10   :  { %759 = vmatpush1.bf16.msra.mxu0 %v758_v14  ;;  %827 = vmatpush3.bf16.msra.mxu1 %v824_v27  ;;  %v25_v3 = vld [vmem:[%s1219_s0 + $0x28] sm:$0xff]  ;;  %v24_v5 = vld [vmem:[%s1219_s0 + $0x20] sm:$0xff]  ;;  %v27_v6 = vld [vmem:[%s1219_s0 + $0x38] sm:$0xff] }
  0x11   :  { %760 = vmatprep.subr.bf16.mxu0 %v890_v0  ;;  %829 = vmatprep.subr.bf16.mxu1 %v828_v33  ;;  %v26_v7 = vld [vmem:[%s1219_s0 + $0x30] sm:$0xff]  ;;  %v553_v8 = vld [vmem:[%s1220_s3 + $0xe0] sm:$0xff]  ;;  %v554_v9 = vld [vmem:[%s1220_s3 + $0xe8] sm:$0xff] }
  0x12   :  { %v840_v10 = vpack.c.bf16 %v554_v9, %v553_v8  ;;  %v212_v11 = vld [vmem:[%s1220_s3 + $0x30] sm:$0xff]  ;;  %v213_v12 = vld [vmem:[%s1220_s3 + $0x38] sm:$0xff]  ;;  %v214_v17 = vld [vmem:[%s1220_s3 + $0x40] sm:$0xff] }
  0x13   :  { %v796_v13 = vpack.c.bf16 %v213_v12, %v212_v11  ;;  %v555_v14 = vld [vmem:[%s1220_s3 + $0xf0] sm:$0xff]  ;;  %v556_v15 = vld [vmem:[%s1220_s3 + $0xf8] sm:$0xff]  ;;  %v215_v18 = vld [vmem:[%s1220_s3 + $0x48] sm:$0xff] }
  0x14   :  { %762 = vmatpush1.bf16.msra.mxu0 %v761_v24  ;;  %831 = vmatpush3.bf16.msra.mxu1 %v828_v33  ;;  %v844_v16 = vpack.c.bf16 %v556_v15, %v555_v14  ;;  %v800_v19 = vpack.c.bf16 %v215_v18, %v214_v17  ;;  %v557_v20 = vld [vmem:[%s1220_s3 + $0x100] sm:$0xff]  ;;  %v558_v21 = vld [vmem:[%s1220_s3 + $0x108] sm:$0xff]  ;;  %v216_v23 = vld [vmem:[%s1220_s3 + $0x50] sm:$0xff] }
  0x15   :  { %763 = vmatprep.subr.bf16.mxu0 %v890_v0  ;;  %833 = vmatprep.subr.bf16.mxu1 %v832_v39  ;;  %v848_v22 = vpack.c.bf16 %v558_v21, %v557_v20  ;;  %v217_v24 = vld [vmem:[%s1220_s3 + $0x58] sm:$0xff]  ;;  %v218_v26 = vld [vmem:[%s1220_s3 + $0x60] sm:$0xff]  ;;  %v219_v27 = vld [vmem:[%s1220_s3 + $0x68] sm:$0xff] }
  0x16   :  { %v804_v25 = vpack.c.bf16 %v217_v24, %v216_v23  ;;  %v808_v28 = vpack.c.bf16 %v219_v27, %v218_v26  ;;  %v220_v29 = vld [vmem:[%s1220_s3 + $0x70] sm:$0xff]  ;;  %v534_v32 = vld [vmem:[%s1221_s2] ss:$0 sm:$0xff]  ;;  %v560_v40 = vld [vmem:[%s1220_s3 + $0x118] sm:$0xff]  ;;  %v163_v27 = vadd.s32 8, %v1145_v41 }
  0x17   :  { %v561_v48 = vld [vmem:[%s1220_s3 + $0x120] sm:$0xff]  ;;  %v563_v60 = vld [vmem:[%s1220_s3 + $0x130] sm:$0xff]  ;;  %v570_v23 = vld [vmem:[%s1220_s3 + $0x168] sm:$0xff] }
  0x18   :  { %765 = vmatpush1.bf16.msra.mxu0 %v764_v30  ;;  %835 = vmatpush3.bf16.msra.mxu1 %v832_v39  ;;  %v221_v30 = vld [vmem:[%s1220_s3 + $0x78] sm:$0xff]  ;;  %v559_v39 = vld [vmem:[%s1220_s3 + $0x110] sm:$0xff]  ;;  %vm171_vm4 = vcmp.ne.s32.totalorder %v163_v27, 15 }
  0x19   :  { %766 = vmatprep.subr.bf16.mxu0 %v890_v0  ;;  %837 = vmatprep.subr.bf16.mxu1 %v836_v45  ;;  %v812_v31 = vpack.c.bf16 %v221_v30, %v220_v29  ;;  %v567_v18 = vld [vmem:[%s1220_s3 + $0x150] sm:$0xff]  ;;  %v572_v26 = vld [vmem:[%s1220_s3 + $0x178] sm:$0xff] }
  0x1c   :  { %768 = vmatpush1.bf16.msra.mxu0 %v767_v36  ;;  %839 = vmatpush3.bf16.msra.mxu1 %v836_v45  ;;  %v852_v45 = vpack.c.bf16 %v560_v40, %v559_v39 }
  0x1d   :  { %769 = vmatprep.subr.bf16.mxu0 %v890_v0  ;;  %841 = vmatprep.subr.bf16.mxu1 %v840_v10 }
  0x20   :  { %771 = vmatpush1.bf16.msra.mxu0 %v770_v42  ;;  %843 = vmatpush3.bf16.msra.mxu1 %v840_v10  ;;  %v891_v10 = vmov 0.0  }
  0x21   :  { %772 = vmatprep.subr.bf16.mxu0 %v890_v0  ;;  %845 = vmatprep.subr.bf16.mxu1 %v844_v16  ;;  %v539_v11 = vsel %vm164_vm3, 1.0, %v891_v10  ;;  %v540_v29 = vsel %vm171_vm4, 1.0, %v891_v10 }
  0x24   :  { %774 = vmatpush1.bf16.msra.mxu0 %v773_v46  ;;  %847 = vmatpush3.bf16.msra.mxu1 %v844_v16 }
  0x25   :  { %775 = vmatprep.subr.bf16.mxu0 %v890_v0  ;;  %849 = vmatprep.subr.bf16.mxu1 %v848_v22 }
  0x28   :  { %777 = vmatpush1.bf16.msra.mxu0 %v776_v49  ;;  %v562_v49 = vld [vmem:[%s1220_s3 + $0x128] sm:$0xff] }
  0x29   :  { %778 = vmatprep.subr.bf16.mxu0 %v890_v0  ;;  %v856_v56 = vpack.c.bf16 %v562_v49, %v561_v48 }
  0x2c   :  { %780 = vmatpush1.bf16.msra.mxu0 %v779_v52 }
  0x2d   :  { %781 = vmatprep.subr.bf16.mxu0 %v890_v0  ;;  %v210_v0 = vld [vmem:[%s1220_s3 + $0x20] sm:$0xff] }
  0x2e   :  { %v792_v4 = vpack.c.bf16 %v211_v1, %v210_v0 }
  0x30   :  { %783 = vmatpush1.bf16.msra.mxu0 %v782_v57 }
  0x31   :  { %785 = vmatprep.subr.bf16.mxu0 %v784_v58 }
  0x33   :  { %137 = vmatmul.mubr.f32.vlgmr.msra.gmra.mrb[0].mxu0 %v20_v61  ;;  %v564_v61 = vld [vmem:[%s1220_s3 + $0x138] sm:$0xff] }
  0x34   :  { %536 = vmatprep.mubr.msk.f32.mxu0 %vm59_vm0, %v23_v62  ;;  %787 = vmatpush3.bf16.msra.mxu0 %v784_v58 }
  0x35   :  { %789 = vmatprep.subr.bf16.mxu0 %v788_v63 }
  0x37   :  { %142 = vmatmul.mubr.f32.gmra.mrb[2].mxu0 %v22_v2 }
  0x38   :  { %537 = vmatprep.mubr.msk.f32.mxu0 %vm59_vm0, %v25_v3  ;;  %791 = vmatpush3.bf16.msra.mxu0 %v788_v63  ;;  %v860_v3 = vpack.c.bf16 %v564_v61, %v563_v60 }
  0x39   :  { %793 = vmatprep.subr.bf16.mxu0 %v792_v4 }
  0x3b   :  { %147 = vmatmul.mubr.f32.gmra.mrb[4].mxu0 %v24_v5 }
  0x3c   :  { %538 = vmatprep.mubr.msk.f32.mxu0 %vm59_vm0, %v27_v6  ;;  %795 = vmatpush3.bf16.msra.mxu0 %v792_v4  ;;  %v565_v6 = vld [vmem:[%s1220_s3 + $0x140] sm:$0xff] }
  0x3d   :  { %797 = vmatprep.subr.bf16.mxu0 %v796_v13 }
  0x3f   :  { %152 = vmatmul.mubr.f32.gmra.mrb[6].mxu0 %v26_v7  ;;  %v566_v7 = vld [vmem:[%s1220_s3 + $0x148] sm:$0xff] }
  0x40   :  { %799 = vmatpush3.bf16.msra.mxu0 %v796_v13  ;;  %v864_v12 = vpack.c.bf16 %v566_v7, %v565_v6 }
  0x41   :  { %801 = vmatprep.subr.bf16.mxu0 %v800_v19 }
  0x44   :  { %803 = vmatpush3.bf16.msra.mxu0 %v800_v19  ;;  %v568_v19 = vld [vmem:[%s1220_s3 + $0x158] sm:$0xff] }
  0x45   :  { %805 = vmatprep.subr.bf16.mxu0 %v804_v25  ;;  %v868_v21 = vpack.c.bf16 %v568_v19, %v567_v18 }
  0x48   :  { %807 = vmatpush3.bf16.msra.mxu0 %v804_v25  ;;  %v571_v25 = vld [vmem:[%s1220_s3 + $0x170] sm:$0xff] }
  0x49   :  { %809 = vmatprep.subr.bf16.mxu0 %v808_v28 }
  0x4c   :  { %811 = vmatpush3.bf16.msra.mxu0 %v808_v28  ;;  %v876_v28 = vpack.c.bf16 %v572_v26, %v571_v25 }
  0x4d   :  { %813 = vmatprep.subr.bf16.mxu0 %v812_v31 }
  0x50   :  { %815 = vmatpush3.bf16.msra.mxu0 %v812_v31 }
 0x106   :  { %v138_v33 = vpop.f32.mrb[0].mxu0 }
 0x107   :  { %v139_v35 = vadd.f32 %v534_v32, %v138_v33  ;;  %v140_v36 = vpop.f32.mrb[1].mxu0 }
 0x109   :  { %v157_v37 = vmax.f32 %v139_v35, 0.0 }
 0x10a   :  { %v143_v38 = vpop.f32.mrb[2].mxu0 }
 0x10b   :  { %v144_v42 = vadd.f32 %v534_v32, %v143_v38  ;;  %v145_v43 = vpop.f32.mrb[3].mxu0  ;;  %704 = vmatprep.mubr.f32.mxu1 %v157_v37  ;;  %v193_v46 = vrot.slane %v157_v37, 7  ;;  %v392_v50 = vrot.slane %v157_v37, 1  ;;  %v573_v37 = vld [vmem:[%s1222_s4] ss:$0 sm:$0xff] }
 0x10d   :  { %v158_v44 = vmax.f32 %v144_v42, 0.0 }
 0x10e   :  { %v148_v47 = vpop.f32.mrb[4].mxu0 }
 0x10f   :  { %v194_v51 = vrot.slane %v158_v44, 7  ;;  %v393_v52 = vrot.slane %v158_v44, 1  ;;  %v149_v53 = vadd.f32 %v534_v32, %v148_v47  ;;  %705 = vmatmul.mubr.f32.vlgmr.msra.gmra.mrb[0].mxu1 %v158_v44  ;;  %v150_v54 = vpop.f32.mrb[5].mxu0 }
 0x110   :  { %851 = vmatpush3.bf16.msra.mxu1 %v848_v22  ;;  %v569_v22 = vld [vmem:[%s1220_s3 + $0x160] sm:$0xff] }
 0x111   :  { %v159_v55 = vmax.f32 %v149_v53, 0.0  ;;  %853 = vmatprep.subr.bf16.mxu1 %v852_v45  ;;  %v399_v57 = vsel %vm396_vm1, %v392_v50, %v393_v52  ;;  %v200_v58 = vsel %vm197_vm2, %v193_v46, %v194_v51  ;;  %v872_v24 = vpack.c.bf16 %v570_v23, %v569_v22 }
 0x112   :  { %v153_v59 = vpop.f32.mrb[6].mxu0 }
 0x113   :  { %v195_v62 = vrot.slane %v159_v55, 7  ;;  %v394_v63 = vrot.slane %v159_v55, 1  ;;  %v154_v0 = vadd.f32 %v534_v32, %v153_v59  ;;  %707 = vmatprep.mubr.f32.mxu1 %v159_v55  ;;  %v155_v1 = vpop.f32.mrb[7].mxu0 }
 0x114   :  { %855 = vmatpush3.bf16.msra.mxu1 %v852_v45 }
 0x115   :  { %v160_v2 = vmax.f32 %v154_v0, 0.0  ;;  %857 = vmatprep.subr.bf16.mxu1 %v856_v56  ;;  %v398_v4 = vsel %vm396_vm1, %v393_v52, %v394_v63  ;;  %v199_v5 = vsel %vm197_vm2, %v194_v51, %v195_v62 }
 0x116   :  { %v204_v20 = vmul.f32 %v539_v11, %v199_v5  ;;  %v402_v30 = vmul.f32 %v540_v29, %v398_v4 }
 0x117   :  { %v196_v8 = vrot.slane %v160_v2, 7  ;;  %v395_v9 = vrot.slane %v160_v2, 1  ;;  %708 = vmatmul.mubr.f32.gmra.mrb[2].mxu1 %v160_v2 }
 0x118   :  { %859 = vmatpush3.bf16.msra.mxu1 %v856_v56  ;;  %742 = vmatprep.mubr.f32.mxu1 %v399_v57 }
 0x119   :  { %861 = vmatprep.subr.bf16.mxu1 %v860_v3  ;;  %v201_v13 = vsel %vm197_vm2, %v196_v8, %v193_v46  ;;  %v198_v14 = vsel %vm197_vm2, %v195_v62, %v196_v8  ;;  %v397_v15 = vsel %vm396_vm1, %v394_v63, %v395_v9  ;;  %v400_v16 = vsel %vm396_vm1, %v395_v9, %v392_v50 }
 0x11a   :  { %v202_v17 = vmul.f32 %v539_v11, %v201_v13  ;;  %v404_v31 = vmul.f32 %v540_v29, %v400_v16 }
 0x11c   :  { %863 = vmatpush3.bf16.msra.mxu1 %v860_v3  ;;  %666 = vmatprep.mubr.f32.mxu0 %v202_v17 }
 0x11d   :  { %667 = vmatmul.mubr.f32.vlgmr.msra.gmra.mrb[8].mxu0 %v200_v58  ;;  %865 = vmatprep.subr.bf16.mxu1 %v864_v12 }
 0x11e   :  { %669 = vmatprep.mubr.f32.mxu0 %v204_v20 }
 0x120   :  { %867 = vmatpush3.bf16.msra.mxu1 %v864_v12 }
 0x121   :  { %869 = vmatprep.subr.bf16.mxu1 %v868_v21  ;;  %670 = vmatmul.mubr.f32.gmra.mrb[10].mxu0 %v198_v14 }
 0x124   :  { %871 = vmatpush3.bf16.msra.mxu1 %v868_v21 }
 0x125   :  { %873 = vmatprep.subr.bf16.mxu1 %v872_v24 }
 0x128   :  { %875 = vmatpush3.bf16.msra.mxu1 %v872_v24 }
 0x129   :  { %877 = vmatprep.subr.bf16.mxu1 %v876_v28 }
 0x12c   :  { %879 = vmatpush3.bf16.msra.mxu1 %v876_v28 }
 0x12f   :  { %743 = vmatmul.mubr.f32.vlgmr.msra.gmra.mrb[0].mxu1 %v402_v30 }
 0x130   :  { %745 = vmatprep.mubr.f32.mxu1 %v397_v15 }
 0x133   :  { %746 = vmatmul.mubr.f32.gmra.mrb[2].mxu1 %v404_v31 }
 0x1f0   :  { %v668_v32 = vpop.f32.mrb[8].mxu0 }
 0x1f1   :  { %v288_v33 = vpop.f32.mrb[9].mxu0 }
 0x1f4   :  { %v671_v34 = vpop.f32.mrb[10].mxu0 }
 0x1f5   :  { %v298_v35 = vpop.f32.mrb[11].mxu0 }
 0x202   :  { %v744_v36 = vpop.f32.mrb[0].mxu1 }
 0x203   :  { %v880_v38 = vadd.f32 %v744_v36, %v668_v32  ;;  %v488_v39 = vpop.f32.mrb[1].mxu1 }
 0x204   :  { %v881_v40 = vadd.f32 %v488_v39, %v288_v33 }
 0x205   :  { %v519_v41 = vadd.f32 %v880_v38, %v573_v37 }
 0x206   :  { %v518_v42 = vadd.f32 %v881_v40, %v573_v37  ;;  %v747_v43 = vpop.f32.mrb[2].mxu1 }
 0x207   :  { %v523_v44 = vmax.f32 %v519_v41, 0.0  ;;  %v882_v45 = vadd.f32 %v747_v43, %v671_v34  ;;  %v498_v46 = vpop.f32.mrb[3].mxu1 }
 0x208   :  { %v522_v47 = vmax.f32 %v518_v42, 0.0  ;;  %v883_v48 = vadd.f32 %v498_v46, %v298_v35 }
 0x209   :  { %527 = vst [vmem:[%s1223_s5 + $0x8] sm:$0xff] %v523_v44  ;;  %v521_v49 = vadd.f32 %v882_v45, %v573_v37 }
 0x20a   :  { %526 = vst [vmem:[%s1223_s5] sm:$0xff] %v522_v47  ;;  %v520_v50 = vadd.f32 %v883_v48, %v573_v37 }
 0x20b   :  { %v525_v51 = vmax.f32 %v521_v49, 0.0 }
 0x20c   :  { %v524_v52 = vmax.f32 %v520_v50, 0.0 }
 0x20d   :  { %529 = vst [vmem:[%s1223_s5 + $0x18] sm:$0xff] %v525_v51 }
 0x20e   :  { %528 = vst [vmem:[%s1223_s5 + $0x10] sm:$0xff] %v524_v52 }

</bundles_post_ra>
